<compile_context>
chip_gen: v6e
topology: v6e:2x2x1
jax: 0.10.0
libtpu: 0.0.40
codegen_flags: <defaults>
</compile_context>

<pallas_src>
import functools

import jax
import jax.numpy as jnp
import numpy as np
from jax.experimental import pallas as pl
from jax.experimental.pallas import tpu as pltpu

EPS = 1e-5


# --------------------------------------------------------------------------- #
# in-kernel helpers
# --------------------------------------------------------------------------- #
def _conv3_nlc(h, w):
    """k=3, padding=1 conv along L.

    h: (tn, L, C)   activation tile in the compute dtype.
    w: (3*C, Cout)  weights, rows [w_tap0; w_tap1; w_tap2]; tap k multiplies
                    h[:, l + k - 1, :].
    Returns (tn, L, Cout) float32.  Conv bias intentionally omitted: it is
    exactly cancelled by the training-mode BN mean subtraction that follows.
    """
    tn, L, C = h.shape
    cout = w.shape[-1]
    l_idx = jax.lax.broadcasted_iota(jnp.int32, (tn, L, 1), 1)

    if C < 128:
        # Small-C regime: fuse the three taps into ONE K=3C MXU matmul.
        # Shifted input copies are built in f32 (layout-safe rolls for packed
        # dtypes); the reshape happens in f32, the cast happens last.
        h32 = h.astype(jnp.float32)
        hm1 = jnp.where(l_idx == 0, 0.0, pltpu.roll(h32, 1, 1))           # h[l-1]
        hp1 = jnp.where(l_idx == L - 1, 0.0, pltpu.roll(h32, L - 1, 1))   # h[l+1]
        cat = (jnp.concatenate([hm1, h32, hp1], axis=-1)
               .reshape(tn * L, 3 * C).astype(h.dtype))
        y = jnp.dot(cat, w, preferred_element_type=jnp.float32)
        return y.reshape(tn, L, cout)

    # Large-C regime: three matmuls on the native compute dtype; roll the f32
    # OUTPUTS instead of the inputs (no input upcast / shifted input copies).
    # NOTE: for bf16 compute prefer L % 16 == 0 so this reshape stays free.
    h2 = h.reshape(tn * L, C)
    y0 = jnp.dot(h2, w[0:C], preferred_element_type=jnp.float32).reshape(tn, L, cout)
    yc = jnp.dot(h2, w[C:2 * C], preferred_element_type=jnp.float32).reshape(tn, L, cout)
    y2 = jnp.dot(h2, w[2 * C:3 * C], preferred_element_type=jnp.float32).reshape(tn, L, cout)
    # output[l] = h[l-1]@w0 + h[l]@w1 + h[l+1]@w2  ==  roll(y0,+1) + yc + roll(y2,-1)
    out = yc
    out = out + jnp.where(l_idx == 0, 0.0, pltpu.roll(y0, 1, 1))
    out = out + jnp.where(l_idx == L - 1, 0.0, pltpu.roll(y2, L - 1, 1))
    return out


def _accumulate_stats(stats_ref, y):
    """Accumulate per-channel sum / sum-of-squares across the inner grid axis.

    stats_ref: (1, 2, C) resident accumulator block (one per core).
    y:         (tn, L, C) f32 conv output for this tile.
    """
    @pl.when(pl.program_id(1) == 0)
    def _():
        stats_ref[...] = jnp.zeros_like(stats_ref)

    y2d = y.reshape(-1, y.shape[-1])
    # Two row-slice updates (no per-step concatenate of the accumulator).
    stats_ref[0:1, 0:1, :] += jnp.sum(y2d, axis=0, keepdims=True)[None]
    stats_ref[0:1, 1:2, :] += jnp.sum(y2d * y2d, axis=0, keepdims=True)[None]


def _bn_affine_from_stats(stats_ref, g_ref, be_ref, inv_count):
    """(per-core sum/sumsq partials, gamma, beta) -> fused BN (scale, shift).

    stats_ref: (nc, 2, C) f32;  g_ref / be_ref: (1, C) f32.
    Training-mode (biased) variance.  TODO(synk): Welford / pilot-mean update
    if E[y^2]-E[y]^2 cancellation becomes an issue at production N*L.
    """
    stats = jnp.sum(stats_ref[...], axis=0)                       # merge cores -> (2, C)
    mean = stats[0:1, :] * inv_count
    var = jnp.maximum(stats[1:2, :] * inv_count - mean * mean, 0.0)
    scale = g_ref[...] * jax.lax.rsqrt(var + EPS)                 # (1, C)
    shift = be_ref[...] - mean * scale                            # (1, C)
    return scale, shift


# --------------------------------------------------------------------------- #
# kernels
# --------------------------------------------------------------------------- #
def _conv1_stats_kernel(x_ref, w1_ref, y1_ref, stats1_ref):
    y = _conv3_nlc(x_ref[...], w1_ref[...])                       # (tn, L, Cout) f32
    _accumulate_stats(stats1_ref, y)
    y1_ref[...] = y.astype(y1_ref.dtype)


def _bn1_relu_conv2_stats_kernel(y1_ref, stats1_ref, g1_ref, be1_ref, w2_ref,
                                 y2_ref, stats2_ref, *, inv_count):
    s1, t1 = _bn_affine_from_stats(stats1_ref, g1_ref, be1_ref, inv_count)
    h = jnp.maximum(y1_ref[...].astype(jnp.float32) * s1 + t1, 0.0)   # BN1 + ReLU (f32)
    h = h.astype(y1_ref.dtype)                                        # compute dtype for MXU
    y = _conv3_nlc(h, w2_ref[...])                                    # (tn, L, Cout) f32
    _accumulate_stats(stats2_ref, y)
    y2_ref[...] = y.astype(y2_ref.dtype)


def _bn2_identity_residual_kernel(x_ref, y2_ref, stats2_ref, g2_ref, be2_ref,
                                  o_ref, *, inv_count):
    # Identity residual path: no 1x1 matmul at all.
    s2, t2 = _bn_affine_from_stats(stats2_ref, g2_ref, be2_ref, inv_count)
    y2 = y2_ref[...].astype(jnp.float32) * s2 + t2
    o_ref[...] = jnp.maximum(x_ref[...].astype(jnp.float32) + y2, 0.0).astype(o_ref.dtype)


def _bn2_proj_residual_kernel(x_ref, wt_ref, bt_ref, y2_ref, stats2_ref,
                              g2_ref, be2_ref, o_ref, *, inv_count):
    tn, L, cin = x_ref.shape
    cout = o_ref.shape[-1]
    s2, t2 = _bn_affine_from_stats(stats2_ref, g2_ref, be2_ref, inv_count)
    residual = jnp.dot(x_ref[...].reshape(tn * L, cin), wt_ref[...],
                       preferred_element_type=jnp.float32).reshape(tn, L, cout)
    residual = residual + bt_ref[...]
    y2 = y2_ref[...].astype(jnp.float32) * s2 + t2
    o_ref[...] = jnp.maximum(residual + y2, 0.0).astype(o_ref.dtype)


# --------------------------------------------------------------------------- #
# host-side configuration helpers
# --------------------------------------------------------------------------- #
def _vmem_config():
    """(vmem_limit_bytes, per-step activation tile budget) per TPU generation."""
    phys = 64 << 20
    try:
        phys = int(getattr(pltpu.get_tpu_info(), "vmem_capacity_bytes", phys))
    except Exception:
        pass
    if phys >= (100 << 20):          # v5e / v6e: 128 MiB physical VMEM per TC
        return 96 << 20, 24 << 20
    return 44 << 20, 12 << 20        # v7x: 64 MiB physical VMEM per TC


def _num_tensorcores():
    """2 on v7x (2 TensorCores/chip), else 1.  Detection failure -> 1 (safe)."""
    try:
        kind = jax.devices()[0].device_kind.lower()
    except Exception:
        return 1
    return 2 if ("v7" in kind or "7x" in kind) else 1


def _pick_tile_n(N, L, C, budget_bytes):
    # ~10 live f32-equivalent copies of one (tile_n, L, C) activation tile per
    # grid step (double-buffered in/out tiles + f32 conv intermediates + rolled
    # outputs).  Largest divisor of N that stays within the budget.
    per_row = max(1, L * C * 4 * 10)
    cap = max(1, budget_bytes // per_row)
    tn = 1
    for d in range(1, N + 1):
        if N % d == 0 and d <= cap:
            tn = d
    # NOTE: prime/awkward N falls back toward tn=1 (correct, but a pathological
    # grid); pad N on the caller side if that matters for throughput.
    return tn


# --------------------------------------------------------------------------- #
# host-side wrapper
# --------------------------------------------------------------------------- #
def resnet_block_forward_nlc(x_nlc, params, *, compute_dtype=jnp.bfloat16,
                             tile_n=None, out_dtype=None, num_cores=None):
    """x_nlc: (N, L, Cin). Returns (N, L, Cout) in out_dtype (default: compute_dtype)."""
    N, L, Cin = x_nlc.shape
    Cout = params["w1"].shape[-1]
    identity_residual = params.get("wt") is None and Cin == Cout
    out_dtype = compute_dtype if out_dtype is None else out_dtype

    vmem_limit, act_budget = _vmem_config()
    tn = tile_n if tile_n is not None else _pick_tile_n(N, L, max(Cin, Cout), act_budget)
    assert N % tn == 0, "tile_n must divide N so BN statistics cover exact rows"
    tiles = N // tn

    nc = _num_tensorcores() if num_cores is None else int(num_cores)
    if nc < 1 or tiles % nc != 0:
        nc = 1
    tpc = tiles // nc                      # tiles per core

    count = float(N * L)
    inv_count = 1.0 / count
    cd = compute_dtype

    xc = x_nlc.astype(cd)                  # single compute-dtype copy (shared by pass 1 & 3)
    w1 = params["w1"].reshape(3 * Cin, Cout).astype(cd)
    w2 = params["w2"].reshape(3 * Cout, Cout).astype(cd)
    g1 = params["g1"].reshape(1, Cout).astype(jnp.float32)
    be1 = params["be1"].reshape(1, Cout).astype(jnp.float32)
    g2 = params["g2"].reshape(1, Cout).astype(jnp.float32)
    be2 = params["be2"].reshape(1, Cout).astype(jnp.float32)

    # ---- specs for the 2-D (core, tile) stats passes ------------------------
    def act2(C):
        return pl.BlockSpec((tn, L, C), lambda c, i: (c * tpc + i, 0, 0))

    def full2(shape):
        return pl.BlockSpec(shape, lambda c, i: (0,) * len(shape))

    stats_out_spec = pl.BlockSpec((1, 2, Cout), lambda c, i: (c, 0, 0))

    # ---- specs for the 1-D (tile) pass 3 ------------------------------------
    def act1(C):
        return pl.BlockSpec((tn, L, C), lambda i: (i, 0, 0))

    def full1(shape):
        return pl.BlockSpec(shape, lambda i: (0,) * len(shape))

    stats_params = pltpu.CompilerParams(
        dimension_semantics=("parallel", "arbitrary"),   # cores parallel, tiles accumulate
        vmem_limit_bytes=vmem_limit)
    par_params = pltpu.CompilerParams(
        dimension_semantics=("parallel",),               # megacore-shardable
        vmem_limit_bytes=vmem_limit)

    # ---- pass 1: conv1 (+ per-core per-channel sum / sumsq) -----------------
    y1, stats1 = pl.pallas_call(
        _conv1_stats_kernel,
        grid=(nc, tpc),
        in_specs=[act2(Cin), full2((3 * Cin, Cout))],
        out_specs=[act2(Cout), stats_out_spec],
        out_shape=[jax.ShapeDtypeStruct((N, L, Cout), cd),
                   jax.ShapeDtypeStruct((nc, 2, Cout), jnp.float32)],
        compiler_params=stats_params,
    )(xc, w1)

    # ---- pass 2: bn1 + relu + conv2 (+ per-core sum / sumsq); BN1 affine is
    #      computed from stats1 inside the kernel (no host-side finalisation).
    y2, stats2 = pl.pallas_call(
        functools.partial(_bn1_relu_conv2_stats_kernel, inv_count=inv_count),
        grid=(nc, tpc),
        in_specs=[act2(Cout), full2((nc, 2, Cout)), full2((1, Cout)),
                  full2((1, Cout)), full2((3 * Cout, Cout))],
        out_specs=[act2(Cout), stats_out_spec],
        out_shape=[jax.ShapeDtypeStruct((N, L, Cout), cd),
                   jax.ShapeDtypeStruct((nc, 2, Cout), jnp.float32)],
        compiler_params=stats_params,
    )(y1, stats1, g1, be1, w2)

    # ---- pass 3: bn2 + residual + relu (parallel over tiles) ----------------
    if identity_residual:
        out = pl.pallas_call(
            functools.partial(_bn2_identity_residual_kernel, inv_count=inv_count),
            grid=(tiles,),
            in_specs=[act1(Cin), act1(Cout), full1((nc, 2, Cout)),
                      full1((1, Cout)), full1((1, Cout))],
            out_specs=act1(Cout),
            out_shape=jax.ShapeDtypeStruct((N, L, Cout), out_dtype),
            compiler_params=par_params,
        )(xc, y2, stats2, g2, be2)
    else:
        wt = params["wt"].astype(cd)
        bt = params["bt"].reshape(1, -1).astype(jnp.float32)
        out = pl.pallas_call(
            functools.partial(_bn2_proj_residual_kernel, inv_count=inv_count),
            grid=(tiles,),
            in_specs=[act1(Cin), full1((Cin, Cout)), full1((1, Cout)),
                      act1(Cout), full1((nc, 2, Cout)),
                      full1((1, Cout)), full1((1, Cout))],
            out_specs=act1(Cout),
            out_shape=jax.ShapeDtypeStruct((N, L, Cout), out_dtype),
            compiler_params=par_params,
        )(xc, wt, bt, y2, stats2, g2, be2)
    return out


def resnet_block_forward(x_ncl, params, *, compute_dtype=jnp.bfloat16,
                         tile_n=None, out_dtype=None, num_cores=None):
    """PyTorch-layout entry: x_ncl (N, Cin, L) -> (N, Cout, L).

    The NCL<->NLC transposes exist only to match the torch Conv1d interface;
    pipelines already carrying NLC activations should call
    resnet_block_forward_nlc directly and skip both HBM round trips.
    """
    x_nlc = jnp.transpose(x_ncl, (0, 2, 1))
    out_nlc = resnet_block_forward_nlc(x_nlc, params, compute_dtype=compute_dtype,
                                       tile_n=tile_n, out_dtype=out_dtype,
                                       num_cores=num_cores)
    return jnp.transpose(out_nlc, (0, 2, 1))


# --------------------------------------------------------------------------- #
# pure-JAX reference (replicates the PyTorch module, training-mode BN, f32)
# --------------------------------------------------------------------------- #
def ref_forward(x_ncl, params):
    def conv1d(x, w_kio, b, pad):
        w_oik = jnp.transpose(w_kio, (2, 1, 0))  # (Cout, Cin, K) == torch layout
        y = jax.lax.conv_general_dilated(
            x, w_oik, window_strides=(1,), padding=[(pad, pad)],
            dimension_numbers=("NCH", "OIH", "NCH"),
            precision=jax.lax.Precision.HIGHEST)
        return y + b[None, :, None]

    def bn(y, gamma, beta):
        mean = jnp.mean(y, axis=(0, 2), keepdims=True)
        var = jnp.mean((y - mean) ** 2, axis=(0, 2), keepdims=True)
        return (y - mean) / jnp.sqrt(var + EPS) * gamma[None, :, None] + beta[None, :, None]

    if params.get("wt") is None:
        residual = x_ncl                                         # torch.nn.Identity
    else:
        residual = conv1d(x_ncl, params["wt"][None, :, :], params["bt"], pad=0)
    h = conv1d(x_ncl, params["w1"], params["b1"], pad=1)         # reference keeps b1/b2
    h = jax.nn.relu(bn(h, params["g1"], params["be1"]))
    h = conv1d(h, params["w2"], params["b2"], pad=1)
    h = bn(h, params["g2"], params["be2"])
    return jax.nn.relu(residual + h)


def init_params(key, in_channels, conv_channels):
    ks = jax.random.split(key, 6)
    if in_channels == conv_channels:
        wt, bt = None, None                                      # torch.nn.Identity
    else:
        wt = 0.1 * jax.random.normal(ks[0], (in_channels, conv_channels), jnp.float32)
        bt = 0.1 * jax.random.normal(ks[1], (conv_channels,), jnp.float32)
    w1 = 0.1 * jax.random.normal(ks[2], (3, in_channels, conv_channels), jnp.float32)
    b1 = 0.1 * jax.random.normal(ks[3], (conv_channels,), jnp.float32)
    w2 = 0.1 * jax.random.normal(ks[4], (3, conv_channels, conv_channels), jnp.float32)
    b2 = 0.1 * jax.random.normal(ks[5], (conv_channels,), jnp.float32)
    return dict(
        wt=wt, bt=bt,
        w1=w1, b1=b1,   # b1/b2 kept in params (torch has them); kernels drop them (BN-cancelled)
        g1=jnp.ones((conv_channels,), jnp.float32),
        be1=jnp.zeros((conv_channels,), jnp.float32),
        w2=w2, b2=b2,
        g2=jnp.ones((conv_channels,), jnp.float32),
        be2=jnp.zeros((conv_channels,), jnp.float32),
    )


def _np32(x):
    return np.asarray(x).astype(np.float32)


if __name__ == "__main__":
    key = jax.random.PRNGKey(0)
    k_x, k_p, k_p2, k_x3, k_p3 = jax.random.split(key, 5)

    # --- projection-residual variant (Cin != Cout), small-C fused-tap path ---
    N, Cin, Cout, L = 2, 4, 8, 16
    x = jax.random.normal(k_x, (N, Cin, L), jnp.float32)   # NCL, like torch Conv1d input
    params = init_params(k_p, Cin, Cout)
    ref = jax.block_until_ready(ref_forward(x, params))

    # f32 compute path: tight match against the torch-semantics reference
    # (also proves dropping the BN-cancelled conv biases is exact).
    # tile_n=1 -> 2 grid steps, exercising the cross-tile stats accumulation.
    out_f32 = jax.block_until_ready(
        resnet_block_forward(x, params, compute_dtype=jnp.float32, tile_n=1))
    assert out_f32.shape == (N, Cout, L), out_f32.shape
    np.testing.assert_allclose(_np32(out_f32), _np32(ref), rtol=1e-4, atol=1e-4)

    # bf16 compute path (default, MXU-friendly), bf16 output: looser tolerance.
    out_bf16 = jax.block_until_ready(resnet_block_forward(x, params, tile_n=1))
    np.testing.assert_allclose(_np32(out_bf16), _np32(ref), rtol=5e-2, atol=5e-2)

    # --- identity-residual variant (Cin == Cout), small-C path ---------------
    x2 = jax.random.normal(k_x, (N, Cout, L), jnp.float32)
    params2 = init_params(k_p2, Cout, Cout)
    ref2 = jax.block_until_ready(ref_forward(x2, params2))
    out2 = jax.block_until_ready(
        resnet_block_forward(x2, params2, compute_dtype=jnp.float32, tile_n=1))
    np.testing.assert_allclose(_np32(out2), _np32(ref2), rtol=1e-4, atol=1e-4)

    # --- lane-dense variant (C = 128): exercises the output-roll 3-matmul path.
    C3 = 128
    x3 = jax.random.normal(k_x3, (N, C3, L), jnp.float32)
    params3 = init_params(k_p3, C3, C3)
    ref3 = jax.block_until_ready(ref_forward(x3, params3))
    out3 = jax.block_until_ready(
        resnet_block_forward(x3, params3, compute_dtype=jnp.float32, tile_n=1))
    np.testing.assert_allclose(_np32(out3), _np32(ref3), rtol=5e-3, atol=5e-3)

    print("KERNEL_OK")
</pallas_src>

<mosaic_0001>
module attributes {stable_mosaic.version = 11 : i64} {
  func.func @_conv1_stats_kernel(%arg0: i32, %arg1: i32, %arg2: memref<1x16x4xf32, #tpu.memory_space<vmem>>, %arg3: memref<12x8xf32, #tpu.memory_space<vmem>>, %arg4: memref<1x16x8xf32, #tpu.memory_space<vmem>>, %arg5: memref<1x2x8xf32, #tpu.memory_space<vmem>>) attributes {dimension_semantics = [#tpu.dimension_semantics<parallel>, #tpu.dimension_semantics<arbitrary>], iteration_bounds = array<i64: 1, 2>, scalar_prefetch = 0 : i64, scratch_operands = 0 : i64, tpu.core_type = #tpu.core_type<tc>, window_params = [{transform_indices = @transform_0, window_bounds = array<i64: 1, 16, 4>}, {pipeline_mode = #tpu.pipeline_mode<synchronous>, transform_indices = @transform_1, window_bounds = array<i64: 12, 8>}, {transform_indices = @transform_2, window_bounds = array<i64: 1, 16, 8>}, {transform_indices = @transform_3, window_bounds = array<i64: 1, 2, 8>}]} {
    %c0 = arith.constant 0 : index
    %c0_0 = arith.constant 0 : index
    %c0_1 = arith.constant 0 : index
    %0 = vector.load %arg2[%c0, %c0_0, %c0_1] : memref<1x16x4xf32, #tpu.memory_space<vmem>>, vector<1x16x4xf32>
    %c0_2 = arith.constant 0 : index
    %c0_3 = arith.constant 0 : index
    %1 = vector.load %arg3[%c0_2, %c0_3] : memref<12x8xf32, #tpu.memory_space<vmem>>, vector<12x8xf32>
    %2 = tpu.iota {dimensions = array<i32: 1>} : vector<1x16x1xi32>
    %c0_i32 = arith.constant 0 : i32
    %3 = vector.broadcast %c0_i32 : i32 to vector<1x16x1xi32>
    %4 = arith.cmpi eq, %2, %3 : vector<1x16x1xi32>
    %c1_i32 = arith.constant 1 : i32
    %5 = tpu.dynamic_rotate %0 by %c1_i32 dim 1 : vector<1x16x4xf32>, i32 -> vector<1x16x4xf32>
    %cst = arith.constant 0.000000e+00 : f32
    %6 = vector.shape_cast %4 : vector<1x16x1xi1> to vector<1x16x1xi1>
    %7 = vector.broadcast %6 : vector<1x16x1xi1> to vector<1x16x4xi1>
    %8 = vector.broadcast %cst : f32 to vector<1x16x4xf32>
    %9 = arith.select %7, %8, %5 : vector<1x16x4xi1>, vector<1x16x4xf32>
    %c15_i32 = arith.constant 15 : i32
    %10 = vector.broadcast %c15_i32 : i32 to vector<1x16x1xi32>
    %11 = arith.cmpi eq, %2, %10 : vector<1x16x1xi32>
    %c15_i32_4 = arith.constant 15 : i32
    %12 = tpu.dynamic_rotate %0 by %c15_i32_4 dim 1 : vector<1x16x4xf32>, i32 -> vector<1x16x4xf32>
    %cst_5 = arith.constant 0.000000e+00 : f32
    %13 = vector.shape_cast %11 : vector<1x16x1xi1> to vector<1x16x1xi1>
    %14 = vector.broadcast %13 : vector<1x16x1xi1> to vector<1x16x4xi1>
    %15 = vector.broadcast %cst_5 : f32 to vector<1x16x4xf32>
    %16 = arith.select %14, %15, %12 : vector<1x16x4xi1>, vector<1x16x4xf32>
    %17 = tpu.concatenate %9, %0, %16 in 2 : vector<1x16x4xf32>, vector<1x16x4xf32>, vector<1x16x4xf32> -> vector<1x16x12xf32>
    %18 = vector.shape_cast %17 : vector<1x16x12xf32> to vector<16x12xf32>
    %cst_6 = arith.constant dense<0.000000e+00> : vector<16x8xf32>
    %19 = tpu.matmul %18, %1, %cst_6 {dimension_numbers = #tpu.dot_dimension_numbers<[1], [0], [0], [1], [0, 0, 1, 1], [], []>} : vector<16x12xf32>, vector<12x8xf32>, vector<16x8xf32> -> vector<16x8xf32>
    %20 = vector.shape_cast %19 : vector<16x8xf32> to vector<1x16x8xf32>
    %c0_i32_7 = arith.constant 0 : i32
    %21 = arith.cmpi eq, %arg1, %c0_i32_7 : i32
    %22 = arith.extui %21 : i1 to i32
    %c0_i32_8 = arith.constant 0 : i32
    %23 = arith.cmpi ne, %22, %c0_i32_8 : i32
    scf.if %23 {
      %cst_25 = arith.constant 0.000000e+00 : f32
      %39 = vector.broadcast %cst_25 : f32 to vector<1x2x8xf32>
      %c0_26 = arith.constant 0 : index
      %c0_27 = arith.constant 0 : index
      %c0_28 = arith.constant 0 : index
      %40 = vector.load %arg5[%c0_26, %c0_27, %c0_28] : memref<1x2x8xf32, #tpu.memory_space<vmem>>, vector<1x2x8xf32>
      tpu.vector_store %arg5[%c0_26, %c0_27, %c0_28], %39 {strides = array<i32>} : memref<1x2x8xf32, #tpu.memory_space<vmem>>, vector<1x2x8xf32>,
    } else {
    }
    %24 = vector.shape_cast %20 : vector<1x16x8xf32> to vector<16x8xf32>
    %c0_9 = arith.constant 0 : index
    %c0_10 = arith.constant 0 : index
    %c0_11 = arith.constant 0 : index
    %25 = vector.load %arg5[%c0_9, %c0_10, %c0_11] : memref<1x2x8xf32, #tpu.memory_space<vmem>>, vector<1x1x8xf32>
    %cst_12 = arith.constant dense<0.000000e+00> : vector<8xf32>
    %26 = vector.multi_reduction <add>, %24, %cst_12 [0] : vector<16x8xf32> to vector<8xf32>
    %27 = vector.shape_cast %26 : vector<8xf32> to vector<1x8xf32>
    %28 = vector.shape_cast %27 : vector<1x8xf32> to vector<1x1x8xf32>
    %29 = arith.addf %25, %28 : vector<1x1x8xf32>
    %c0_13 = arith.constant 0 : index
    %c0_14 = arith.constant 0 : index
    %c0_15 = arith.constant 0 : index
    %30 = vector.load %arg5[%c0_13, %c0_14, %c0_15] : memref<1x2x8xf32, #tpu.memory_space<vmem>>, vector<1x1x8xf32>
    tpu.vector_store %arg5[%c0_13, %c0_14, %c0_15], %29 {strides = array<i32>} : memref<1x2x8xf32, #tpu.memory_space<vmem>>, vector<1x1x8xf32>,
    %c0_16 = arith.constant 0 : index
    %c1 = arith.constant 1 : index
    %c0_17 = arith.constant 0 : index
    %31 = vector.load %arg5[%c0_16, %c1, %c0_17] : memref<1x2x8xf32, #tpu.memory_space<vmem>>, vector<1x1x8xf32>
    %32 = arith.mulf %24, %24 : vector<16x8xf32>
    %cst_18 = arith.constant dense<0.000000e+00> : vector<8xf32>
    %33 = vector.multi_reduction <add>, %32, %cst_18 [0] : vector<16x8xf32> to vector<8xf32>
    %34 = vector.shape_cast %33 : vector<8xf32> to vector<1x8xf32>
    %35 = vector.shape_cast %34 : vector<1x8xf32> to vector<1x1x8xf32>
    %36 = arith.addf %31, %35 : vector<1x1x8xf32>
    %c0_19 = arith.constant 0 : index
    %c1_20 = arith.constant 1 : index
    %c0_21 = arith.constant 0 : index
    %37 = vector.load %arg5[%c0_19, %c1_20, %c0_21] : memref<1x2x8xf32, #tpu.memory_space<vmem>>, vector<1x1x8xf32>
    tpu.vector_store %arg5[%c0_19, %c1_20, %c0_21], %36 {strides = array<i32>} : memref<1x2x8xf32, #tpu.memory_space<vmem>>, vector<1x1x8xf32>,
    %c0_22 = arith.constant 0 : index
    %c0_23 = arith.constant 0 : index
    %c0_24 = arith.constant 0 : index
    %38 = vector.load %arg4[%c0_22, %c0_23, %c0_24] : memref<1x16x8xf32, #tpu.memory_space<vmem>>, vector<1x16x8xf32>
    tpu.vector_store %arg4[%c0_22, %c0_23, %c0_24], %20 {strides = array<i32>} : memref<1x16x8xf32, #tpu.memory_space<vmem>>, vector<1x16x8xf32>,
    return
  }
  func.func @transform_0(%arg0: i32, %arg1: i32) -> (i32, i32, i32) {
    %c2_i32 = arith.constant 2 : i32
    %0 = arith.muli %arg0, %c2_i32 : i32
    %1 = arith.addi %0, %arg1 : i32
    %c0_i32 = arith.constant 0 : i32
    %c0_i32_0 = arith.constant 0 : i32
    %c0_i32_1 = arith.constant 0 : i32
    return %1, %c0_i32, %c0_i32_0 : i32, i32, i32
  }
  func.func @transform_1(%arg0: i32, %arg1: i32) -> (i32, i32) {
    %c0_i32 = arith.constant 0 : i32
    %c0_i32_0 = arith.constant 0 : i32
    %c0_i32_1 = arith.constant 0 : i32
    return %c0_i32, %c0_i32_0 : i32, i32
  }
  func.func @transform_2(%arg0: i32, %arg1: i32) -> (i32, i32, i32) {
    %c2_i32 = arith.constant 2 : i32
    %0 = arith.muli %arg0, %c2_i32 : i32
    %1 = arith.addi %0, %arg1 : i32
    %c0_i32 = arith.constant 0 : i32
    %c0_i32_0 = arith.constant 0 : i32
    %c0_i32_1 = arith.constant 0 : i32
    return %1, %c0_i32, %c0_i32_0 : i32, i32, i32
  }
  func.func @transform_3(%arg0: i32, %arg1: i32) -> (i32, i32, i32) {
    %c0_i32 = arith.constant 0 : i32
    %c0_i32_0 = arith.constant 0 : i32
    %c0_i32_1 = arith.constant 0 : i32
    return %arg0, %c0_i32, %c0_i32_0 : i32, i32, i32
  }
}

</mosaic_0001>

<bundles_post_ra>
// kernel: tpu_custom_call.1
= control target key start
LH: loop header
LB: loop body
LE: loop exit
PB: predicated region body
PF: predicated region fallthrough
CT: control target
= control target key end

     0   :  { %9 = vsyncpa [#allocation3], 0  ;;  %s625_s12 = smov 0   ;;  %s627_s13 = smov 0   ;;  %s699_s0 = inlined_call_operand.vmem [shape: f32[2,16,4], index: 0, kind: input, shape index: {}]   ;;  %s700_s1 = inlined_call_operand.vmem [shape: f32[12,8], index: 1, kind: input, shape index: {}]   ;;  %s701_s2 = inlined_call_operand.vmem [shape: f32[2,16,8], index: 2, kind: output, shape index: {0}]   ;;  %s702_s3 = inlined_call_operand.hbm [shape: f32[1,2,8], index: 3, kind: output, shape index: {1}]  }
   0x1   :  { %s629_s14 = smov 0  }
   0x2 LB: > { %s485_s15 = sadd.s32 4294967295, %s599_s14   ;;  %s24_s16 = sadd.s32 1, %s595_s13  ;;  %s599_s14 = sphi %s629_s14, %s15_s14   ;;  %s595_s13 = sphi %s627_s13, %s705_s13   ;;  %s591_s12 = sphi %s625_s12, %s704_s12  }
   0x3   : > { %p25_p0 = scmp.ge.s32.totalorder %s24_s16, 2  ;;  %p489_p1 = scmp.ge.s32.totalorder %s599_s14, 1 }
   0x4   : > { %p165_p2 = scmp.lt.s32.totalorder %s599_s14, 3 }
   0x5   : > { %s707_s16 = smov (%p25_p0, %s24_s16), 0 }
   0x6   : > { %p166_p3 = pnand %p489_p1, %p165_p2 }
   0x7   : > { %p195_p4 = scmp.lt.s32.totalorder (!%p166_p3), %s591_s12, 1  ;;  %s601_s29 = smov (!%p166_p3), 4  }
   0x8   : > { %169 = sbr.rel (%p166_p3) target bundleno = 362 (0x16a), region = 28  ;;  %s602_s30 = smov (!%p166_p3), 8  }
   0x9   : > { %p497_p5 = scmp.ne.s32.totalorder (!%p166_p3), %s591_s12, 0 }
   0xd   : > { %v215_v0 = vlaneseq  ;;  %v214_v1 = vld [vmem:[%s700_s1 + $0x8] sm:$0xf]  ;;  %vm273_vm0 = vcmask 1043456   ;;  %v213_v2 = vld [vmem:[%s700_s1] sm:$0xff]  ;;  %s196_s21 = scalar_select %p195_p4, %s591_s12, 1  ;;  %vm260_vm5 = vcmask 31744  }
   0xe   : > { %508 = vmatprep.subr.msk.mxu0 %vm273_vm0, %v214_v1  ;;  %vm263_vm6 = vcmask 64512   ;;  %vm266_vm7 = vcmask 97280  }
   0xf   : > { %v216_v3 = vshrl.u32 %v215_v0, 7  ;;  %509 = vmatpush3.msk.msra.mxu0 %vm273_vm0, %v214_v1  ;;  %s502_s22 = sshll.u32 %s196_s21, 4 }
  0x10   : > { %510 = vmatprep.subr.mxu0 %v213_v2  ;;  %s199_s25 = scalar_lea.vmem %s699_s0, %s502_s22  ;;  %s660_s28 = scalar_lea.vmem %s701_s2, %s502_s22 }
  0x11   : > { %v217_v4 = vadd.s32 8, %v216_v3  ;;  %511 = vmatpush3.msra.mxu0 %v213_v2  ;;  %v211_v5 = vld [vmem:[%s199_s25] sm:$0xff]  ;;  %v212_v6 = vld [vmem:[%s199_s25 + $0x8] sm:$0xff]  ;;  %vm235_vm1 = vcmp.lt.s32.totalorder %v216_v3, 7  ;;  %vm218_vm2 = vcmp.eq.s32.totalorder %v216_v3, 0  ;;  %vm222_vm3 = vcmp.lt.s32.totalorder %v216_v3, 1 }
  0x12   : > { %v221_v7 = vrot.slane %v212_v6, 7  ;;  %246 = vrot.lane.b32.xlu0 %v211_v5, %s601_s29  ;;  %v220_v8 = vrot.slane %v211_v5, 7  ;;  %v233_v9 = vrot.slane %v211_v5, 1  ;;  %v234_v10 = vrot.slane %v212_v6, 1 }
  0x13   : > { %vm232_vm4 = vcmp.eq.s32.totalorder %v217_v4, 15 }
  0x14   : > { %v236_v11 = vsel %vm235_vm1, %v233_v9, %v234_v10  ;;  %v237_v12 = vsel %vm235_vm1, %v234_v10, %v233_v9  ;;  %v224_v13 = vsel %vm222_vm3, %v221_v7, %v220_v8  ;;  %v223_v14 = vsel %vm222_vm3, %v220_v8, %v221_v7 }
  0x15   : > { %254 = vrot.lane.b32.xlu1 %v236_v11, %s602_s30  ;;  %v229_v15 = vsel %vm218_vm2, 0.0, %v224_v13  ;;  %v243_v16 = vsel %vm232_vm4, 0.0, %v237_v12 }
  0x16   : > { %248 = vrot.lane.b32.xlu0 %v212_v6, %s601_s29 }
  0x19   : > { %256 = vrot.lane.b32.xlu1 %v243_v16, %s602_s30 }
  0x84   : > { %v247_v17 = vpop.permute.xlu0 %246 }
  0x85   : > { %v261_v18 = vsel %vm260_vm5, %v229_v15, %v247_v17 }
  0x87   : > { %v255_v19 = vpop.permute.xlu1 %254 }
  0x88   : > { %v264_v20 = vsel %vm263_vm6, %v261_v18, %v255_v19  ;;  %v249_v21 = vpop.permute.xlu0 %248 }
  0x89   : > { %512 = vmatprep.mubr.msk.f32.mxu0 %vm266_vm7, %v264_v20  ;;  %v262_v22 = vsel %vm260_vm5, %v223_v14, %v249_v21 }
  0x8b   : > { %v257_v23 = vpop.permute.xlu1 %256 }
  0x8c   : > { %v265_v24 = vsel %vm263_vm6, %v262_v22, %v257_v23 }
  0x8d   : > { %513 = vmatmul.mubr.msk.f32.vlgmr.msra.gmra.mxu0 %vm266_vm7, %v265_v24 }
 0x14b   : > { %355 = sbr.rel (%p497_p5) target bundleno = 338 (0x152), region = 32 }
 0x14d   : > { %v514_v25 = vpop.f32.mrf.mxu0 }
 0x14f   : > { %v343_v26 = vpop.f32.mrf.mxu0 }
 0x150   : > { %vm356_vm8 = vcmask 58368   ;;  %v603_v27 = vmov 0.0  }
 0x151   : > { %357 = vst.msk [vmem:[#allocation2] sm:$0x3] %vm356_vm8, %v603_v27 }
 0x152 PF: > { %v359_v28 = vsel %vm263_vm6, %v343_v26, 0.0  ;;  %v360_v29 = vsel %vm263_vm6, %v514_v25, 0.0  ;;  %v372_v30 = vmul.f32 %v343_v26, %v343_v26  ;;  %385 = vst.msk [vmem:[%s660_s28] sm:$0xff] %vm263_vm6, %v343_v26  ;;  %386 = vst.msk [vmem:[%s660_s28 + $0x8] sm:$0xff] %vm263_vm6, %v514_v25  ;;  %v373_v32 = vmul.f32 %v514_v25, %v514_v25  ;;  %s604_s4 = smov [#allocation2]   ;;  %p675_p6 = scmp.eq.s32.totalorder %s485_s15, 1 }
 0x153   : > { %v361_v31 = vadd.f32 %v360_v29, %v359_v28  ;;  %vm369_vm9 = vcmask 57344   ;;  %s408_s5 = sshll.u32 %s604_s4, 4  ;;  %s409_s5 = int_to_ptr.vmem [resolvable:$true] %s408_s5 }
 0x154   : > { %v374_v33 = vsel %vm263_vm6, %v372_v30, 0.0  ;;  %v375_v35 = vsel %vm263_vm6, %v373_v32, 0.0  ;;  %s549_s7 = scalar_lea.vmem %s409_s5, 32  ;;  %p556_p10 = scmp.lt.s32.totalorder %s409_s5, %s409_s5 }
 0x155   : > { %v362_v34 = vrot.slane %v361_v31, 4  ;;  %v376_v36 = vadd.f32 %v375_v35, %v374_v33  ;;  %p550_p7 = scmp.ne.s32.totalorder %s409_s5, %s549_s7  ;;  %p557_p11 = scmp.lt.s32.totalorder %s549_s7, %s549_s7 }
 0x157   : > { %v363_v37 = vadd.f32 %v362_v34, %v361_v31  ;;  %v377_v38 = vrot.slane %v376_v36, 4  ;;  %p551_p8 = pnand %p550_p7, %p675_p6  ;;  %p558_p12 = por %p557_p11, %p556_p10 }
 0x158   : > { %v358_v44 = vld [vmem:[#allocation2] sm:$0x1]  ;;  %v371_v49 = vld [vmem:[#allocation2 + $0x1] sm:$0x1] }
 0x159   : > { %v364_v39 = vrot.slane %v363_v37, 2  ;;  %v378_v40 = vadd.f32 %v377_v38, %v376_v36  ;;  %p552_p9 = pneg %p551_p8 }
 0x15b   : > { %v365_v41 = vadd.f32 %v364_v39, %v363_v37  ;;  %v379_v42 = vrot.slane %v378_v40, 2  ;;  %p559_p13 = pnand %p558_p12, %p552_p9 }
 0x15d   : > { %v366_v43 = vrot.slane %v365_v41, 1  ;;  %v380_v45 = vadd.f32 %v379_v42, %v378_v40 }
 0x15f   : > { %v367_v46 = vadd.f32 %v366_v43, %v365_v41  ;;  %v381_v47 = vrot.slane %v380_v45, 1 }
 0x161   : > { %v368_v48 = vadd.f32 %v367_v46, %v358_v44  ;;  %v382_v50 = vadd.f32 %v381_v47, %v380_v45 }
 0x163   : > { %370 = vst.msk [vmem:[#allocation2] sm:$0x1] %vm369_vm9, %v368_v48  ;;  %v383_v51 = vadd.f32 %v382_v50, %v371_v49 }
 0x165   : > { %384 = vst.msk [vmem:[#allocation2 + $0x1] sm:$0x1] %vm369_vm9, %v383_v51 }
 0x166   : > { %562 = shalt.err (!%p559_p13)
}
 0x167   : > { %516 = dma.vmem_to_hbm [thread:$0]  (%p675_p6), %s409_s5, 32, %s702_s3, [#allocation3]  }
 0x168   : > { %586 = dma.done.wait (%p675_p6), [#allocation3], 32  }
 0x169   : > { %588 = vsyncadd (%p675_p6), [#allocation3], 4294967264 }
 0x16a PF: > { %s15_s14 = sadd.s32 1, %s599_s14   ;;  %s704_s12 = smov %s595_s13 }
 0x16b   : > { %p12_p0 = scmp.ge.s32.totalorder %s15_s14, 4   ;;  %s705_s13 = smov %s707_s16 }
 0x16d   :  { %14 = sbr.rel (!%p12_p0) target bundleno = 2 (0x2), region = 72 }
 0x172   :  { %431 = vsyncpa [#allocation3], 1 }
 0x173   :  { %433 = vsyncpa [#allocation3 + $0x1], 1 }

</bundles_post_ra>
